<compile_context>
chip_gen: v7x
topology: tpu7x:2x2x1
jax: 0.10.0
libtpu: 0.0.40
codegen_flags: <defaults>
</compile_context>

<pallas_src>
import jax
import jax.numpy as jnp
from jax import lax
from jax.experimental import pallas as pl
from jax.experimental.pallas import tpu as pltpu

_LANES = 1024                        # generic-path lane width (multiple of 128)
_TARGET_TILE_ELEMS = 1024 * 1024     # ~4 MiB per f32 tile
_TARGET_GRID_STEPS = 8               # >= 4 steps per TensorCore on v7x megacore
_VMEM_LIMIT_BYTES = 32 * 1024 * 1024


def _cdiv(a, b):
    return -(-a // b)


def _round_up(x, m):
    return ((x + m - 1) // m) * m


def _sublane_multiple(dtype):
    # f32 -> 8, bf16/f16 -> 16, int8/fp8 -> 32
    itemsize = jnp.dtype(dtype).itemsize
    return max(8, 8 * (4 // max(1, itemsize)))


def _loss_f32(x):
    prob = jax.nn.sigmoid(x)
    # Single log instead of log(p) + log(1-p): the product underflows to exactly 0
    # iff fp32 sigmoid saturated (p == 0 or p == 1), i.e. the clamp fires in the
    # same regime as the PyTorch formula.
    return -0.5 * jnp.maximum(jnp.log(prob * (1.0 - prob)), -100.0)


def _elementwise_kernel(x_ref, o_ref):
    x = x_ref[...].astype(jnp.float32)
    o_ref[...] = _loss_f32(x).astype(o_ref.dtype)


def _make_mean_kernel(rem, needs_mask, inv_n):
    """rem: number of valid elements in the last grid block (trace-time Python int)."""

    def kernel(x_ref, o_ref, acc_ref):
        i = pl.program_id(0)
        last = pl.num_programs(0) - 1

        @pl.when(i == 0)
        def _():
            acc_ref[...] = jnp.zeros_like(acc_ref)

        loss = _loss_f32(x_ref[...].astype(jnp.float32))

        if needs_mask:
            # Unmasked fast path for every step except the last.
            @pl.when(i != last)
            def _():
                acc_ref[...] += loss

            # Only the last block can contain padded / out-of-bounds elements.
            @pl.when(i == last)
            def _():
                shape = loss.shape
                row = lax.broadcasted_iota(jnp.int32, shape, 0)
                col = lax.broadcasted_iota(jnp.int32, shape, 1)
                local = row * shape[1] + col          # in-block index: no i32 overflow
                acc_ref[...] += jnp.where(local < rem, loss, 0.0)
        else:
            acc_ref[...] += loss

        @pl.when(i == last)
        def _():
            s = jnp.sum(acc_ref[...], axis=0, keepdims=True)   # (1, cols)
            o_ref[...] = jnp.sum(s, axis=1, keepdims=True) * inv_n

    return kernel


def _to_2d(logits, mult):
    """Lane/sublane-aligned 2D view: rows % mult == 0, cols % 128 == 0.

    Zero-copy when the trailing dim is already a multiple of 128 and the leading rows
    are aligned; otherwise pads the minimum amount (<= mult rows / < mult*_LANES elems).
    """
    n = logits.size
    if logits.ndim >= 2 and logits.shape[-1] % 128 == 0:
        cols = logits.shape[-1]
        rows = n // cols
        x2d = logits.reshape(rows, cols)
        if rows % mult:
            x2d = jnp.pad(x2d, ((0, _round_up(rows, mult) - rows), (0, 0)))
        return x2d
    cols = _LANES
    padded = _round_up(n, mult * cols)
    flat = logits.reshape(-1)
    if padded != n:
        flat = jnp.pad(flat, (0, padded - n))
    return flat.reshape(padded // cols, cols)


def _pick_block_rows(rows, cols, mult):
    cap = max(mult, (_TARGET_TILE_ELEMS // cols) // mult * mult)
    want = _round_up(_cdiv(rows, _TARGET_GRID_STEPS), mult)
    return max(mult, min(cap, want, rows))


def label_smooth_loss(logits, reduction="none"):
    """Pallas implementation of LabelSmoothLoss.forward for arbitrary-shaped logits."""
    orig_shape = logits.shape
    orig_dtype = logits.dtype
    n = logits.size

    if n == 0:  # degenerate edge case (torch.mean of empty -> nan)
        if reduction == "mean":
            return jnp.array(jnp.nan, dtype=orig_dtype)
        return jnp.zeros(orig_shape, orig_dtype)

    mult = _sublane_multiple(orig_dtype)
    x2d = _to_2d(logits, mult)
    rows, cols = x2d.shape
    block_rows = _pick_block_rows(rows, cols, mult)
    grid = _cdiv(rows, block_rows)
    needs_mask = grid * block_rows * cols != n
    rem = n - (grid - 1) * block_rows * cols   # valid elements in the last block

    if reduction == "mean":
        kernel = _make_mean_kernel(rem, needs_mask, 1.0 / float(n))
        out = pl.pallas_call(
            kernel,
            out_shape=jax.ShapeDtypeStruct((1, 1), jnp.float32),
            grid_spec=pltpu.PrefetchScalarGridSpec(
                num_scalar_prefetch=0,
                grid=(grid,),
                in_specs=[pl.BlockSpec((block_rows, cols), lambda i: (i, 0))],
                out_specs=pl.BlockSpec((1, 1), lambda i: (0, 0)),
                scratch_shapes=[pltpu.VMEM((block_rows, cols), jnp.float32)],
            ),
            compiler_params=pltpu.CompilerParams(
                dimension_semantics=("arbitrary",),
                vmem_limit_bytes=_VMEM_LIMIT_BYTES,
            ),
        )(x2d)
        return out[0, 0].astype(orig_dtype)

    # reduction == 'none' (module default): elementwise loss, same shape/dtype.
    out2d = pl.pallas_call(
        _elementwise_kernel,
        out_shape=jax.ShapeDtypeStruct((rows, cols), orig_dtype),
        grid_spec=pltpu.PrefetchScalarGridSpec(
            num_scalar_prefetch=0,
            grid=(grid,),
            in_specs=[pl.BlockSpec((block_rows, cols), lambda i: (i, 0))],
            out_specs=pl.BlockSpec((block_rows, cols), lambda i: (i, 0)),
        ),
        compiler_params=pltpu.CompilerParams(
            dimension_semantics=("parallel",),
            vmem_limit_bytes=_VMEM_LIMIT_BYTES,
        ),
    )(x2d)

    if rows * cols == n:              # aligned: pure reshape, no slice copy
        return out2d.reshape(orig_shape)
    return out2d.reshape(-1)[:n].reshape(orig_shape)


if __name__ == "__main__":
    key = jax.random.PRNGKey(0)
    k1, k2, k3 = jax.random.split(key, 3)

    def ref_loss(x):
        p = jax.nn.sigmoid(x.astype(jnp.float32))
        return -0.5 * jnp.maximum(jnp.log(p) + jnp.log(1.0 - p), -100.0)

    # Aligned shape -> zero-copy fast path (no pad, no output slice).
    logits = jax.random.normal(k1, (16, 128), dtype=jnp.float32) * 3.0
    out = jax.block_until_ready(label_smooth_loss(logits, reduction="none"))
    ref = ref_loss(logits)
    assert out.shape == logits.shape and out.dtype == logits.dtype
    assert jnp.allclose(out, ref, atol=1e-5, rtol=1e-5)

    # Awkward, non-aligned shape exercises the flatten/min-pad/partial-block path.
    logits2 = jax.random.normal(k2, (5, 37), dtype=jnp.float32) * 4.0
    out2 = jax.block_until_ready(label_smooth_loss(logits2, reduction="none"))
    ref2 = ref_loss(logits2)
    assert out2.shape == logits2.shape
    assert jnp.allclose(out2, ref2, atol=1e-5, rtol=1e-5)

    # Fused in-kernel 'mean' reduction (tail masked only in the last grid step).
    out_mean = jax.block_until_ready(label_smooth_loss(logits2, reduction="mean"))
    assert jnp.allclose(out_mean, jnp.mean(ref2), atol=1e-5, rtol=1e-5)
    out_mean_big = jax.block_until_ready(label_smooth_loss(logits, reduction="mean"))
    assert jnp.allclose(out_mean_big, jnp.mean(ref), atol=1e-5, rtol=1e-5)

    # Saturation / clamp parity (|x| large enough that fp32 sigmoid hits exactly 0/1).
    logits3 = jnp.array([[-120.0, -30.0, 0.0, 20.0] * 32] * 8, dtype=jnp.float32)
    out3 = jax.block_until_ready(label_smooth_loss(logits3, reduction="none"))
    assert jnp.allclose(out3, ref_loss(logits3), atol=1e-5, rtol=1e-5)

    # bf16 logits exercise the (16,128) sublane-multiple handling.
    logits4 = (jax.random.normal(k3, (32, 256), dtype=jnp.float32) * 3.0).astype(jnp.bfloat16)
    out4 = jax.block_until_ready(label_smooth_loss(logits4, reduction="none"))
    ref4 = ref_loss(logits4).astype(jnp.bfloat16)
    assert out4.dtype == jnp.bfloat16
    assert jnp.allclose(out4.astype(jnp.float32), ref4.astype(jnp.float32), atol=2e-2, rtol=2e-2)

    print("KERNEL_OK")
</pallas_src>

<mosaic_0001>
module attributes {stable_mosaic.version = 11 : i64} {
  func.func @_elementwise_kernel(%arg0: i32, %arg1: memref<8x128xf32, #tpu.memory_space<vmem>>, %arg2: memref<8x128xf32, #tpu.memory_space<vmem>>) attributes {dimension_semantics = [#tpu.dimension_semantics<parallel>], iteration_bounds = array<i64: 2>, scalar_prefetch = 0 : i64, scratch_operands = 0 : i64, tpu.core_type = #tpu.core_type<tc>, window_params = [{transform_indices = @transform_0, window_bounds = array<i64: 8, 128>}, {transform_indices = @transform_1, window_bounds = array<i64: 8, 128>}]} {
    %c0 = arith.constant 0 : index
    %c0_0 = arith.constant 0 : index
    %0 = vector.load %arg1[%c0, %c0_0] : memref<8x128xf32, #tpu.memory_space<vmem>>, vector<8x128xf32>
    %1 = arith.negf %0 : vector<8x128xf32>
    %2 = math.exp %1 : vector<8x128xf32>
    %cst = arith.constant 1.000000e+00 : f32
    %3 = vector.broadcast %cst : f32 to vector<8x128xf32>
    %4 = arith.addf %3, %2 : vector<8x128xf32>
    %5 = arith.divf %3, %4 : vector<8x128xf32>
    %cst_1 = arith.constant 1.000000e+00 : f32
    %6 = vector.broadcast %cst_1 : f32 to vector<8x128xf32>
    %7 = arith.subf %6, %5 : vector<8x128xf32>
    %8 = arith.mulf %5, %7 : vector<8x128xf32>
    %9 = math.log %8 : vector<8x128xf32>
    %cst_2 = arith.constant -1.000000e+02 : f32
    %10 = vector.broadcast %cst_2 : f32 to vector<8x128xf32>
    %11 = arith.maximumf %9, %10 : vector<8x128xf32>
    %cst_3 = arith.constant -5.000000e-01 : f32
    %12 = vector.broadcast %cst_3 : f32 to vector<8x128xf32>
    %13 = arith.mulf %12, %11 : vector<8x128xf32>
    %c0_4 = arith.constant 0 : index
    %c0_5 = arith.constant 0 : index
    %14 = vector.load %arg2[%c0_4, %c0_5] : memref<8x128xf32, #tpu.memory_space<vmem>>, vector<8x128xf32>
    tpu.vector_store %arg2[%c0_4, %c0_5], %13 {strides = array<i32>} : memref<8x128xf32, #tpu.memory_space<vmem>>, vector<8x128xf32>,
    return
  }
  func.func @transform_0(%arg0: i32) -> (i32, i32) {
    %c0_i32 = arith.constant 0 : i32
    %c0_i32_0 = arith.constant 0 : i32
    return %arg0, %c0_i32 : i32, i32
  }
  func.func @transform_1(%arg0: i32) -> (i32, i32) {
    %c0_i32 = arith.constant 0 : i32
    %c0_i32_0 = arith.constant 0 : i32
    return %arg0, %c0_i32 : i32, i32
  }
}

</mosaic_0001>

<bundles_post_ra>
// kernel: tpu_custom_call.1
= control target key start
LH: loop header
LB: loop body
LE: loop exit
PB: predicated region body
PF: predicated region fallthrough
CT: control target
= control target key end

     0   :  { %6 = vsyncpa [#allocation3], 0  ;;  %s566_s0 = inlined_call_operand.hbm [shape: f32[16,128], index: 0, kind: input, shape index: {}]   ;;  %s567_s1 = inlined_call_operand.hbm [shape: f32[16,128], index: 1, kind: output, shape index: {}]  }
   0x1   :  { %8 = vsyncpa [#allocation3 + $0x1], 0 }
   0x2   :  { %9 = vsyncpa [#allocation4], 0 }
   0x3   :  { %11 = vsyncpa [#allocation4 + $0x1], 0  ;;  %s405_s6 = smov 0   ;;  %s407_s7 = smov 0  }
   0x4   :  { %s409_s8 = smov 0   ;;  %s411_s9 = smov 0  }
   0x5 LB: > { %s426_s10 = sadd.s32 4294967295, %s391_s9   ;;  %s230_s11 = sadd.s32 4294967294, %s391_s9   ;;  %s391_s9 = sphi %s411_s9, %s582_s9   ;;  %s387_s8 = sphi %s409_s8, %s581_s8   ;;  %s383_s7 = sphi %s407_s7, %s580_s7   ;;  %s379_s6 = sphi %s405_s6, %s579_s6  }
   0x6   : > { %s430_s12 = sadd.s32 1, %s391_s9   ;;  %s24_s13 = sadd.s32 1, %s387_s8 }
   0x7   : > { %s21_s14 = ssub.s32 %s391_s9, %s430_s12  ;;  %p31_p0 = scmp.ne.s32.totalorder %s387_s8, %s383_s7 }
   0x8   : > { %p22_p1 = scmp.eq.s32.totalorder %s21_s14, 0  ;;  %p32_p2 = scmp.eq.s32.totalorder %s391_s9, 0 }
   0x9   : > { %p37_p3 = scmp.ne.s32.totalorder %s383_s7, %s379_s6  ;;  %p38_p4 = scmp.eq.s32.totalorder %s426_s10, 0 }
   0xa   : > { %s442_s15 = scalar_select %p22_p1, %s387_s8, %s24_s13  }
   0xb   : > { %p444_p5 = por %p32_p2, %p31_p0  ;;  %p448_p6 = por %p38_p4, %p37_p3 }
   0xc   : > { %p61_p7 = scmp.eq.s32.totalorder %s426_s10, 1  ;;  %p67_p8 = scmp.eq.s32.totalorder %s230_s11, 1 }
   0xd   : > { %p255_p10 = scmp.lt.s32.totalorder %s391_s9, 2  ;;  %s87_s20 = sand.u32 1, %s387_s8  }
   0xe   : > { %p455_p11 = por %p61_p7, %p31_p0  ;;  %p459_p12 = por %p67_p8, %p37_p3 }
   0xf   : > { %s234_s21 = sshll.u32 %s391_s9, 7  ;;  %s233_s22 = sshll.u32 %s87_s20, 3 }
  0x10   : > { %s571_s18 = scalar_select %p455_p11, 1, 0 }
  0x11   : > { %s572_s19 = scalar_select %p459_p12, 1, 0 }
  0x12   : > { %s468_s25 = scalar_lea.hbm %s566_s0, %s234_s21  ;;  %s91_s26 = scalar_lea.vmem [#allocation2], %s233_s22 }
  0x13   : > { %s98_s27 = sshll.u32 %s91_s26, 4  ;;  %p472_p13 = pnand %p255_p10, %p444_p5  ;;  %s476_s27 = int_to_ptr.vmem [resolvable:$true] %s98_s27 }
  0x14   : > { %s88_s29 = scalar_lea.sflag [#allocation3], %s87_s20  ;;  %s295_s30 = scalar_lea.hbm %s468_s25, 128 }
  0x15   : > { %p296_p2 = scmp.ne.s32.totalorder %s468_s25, %s295_s30  ;;  %p297_p3 = pneg %p472_p13 }
  0x16   : > { %s300_s4 = scalar_lea.hbm %s566_s0, 256  ;;  %p301_p5 = scmp.lt.u32.totalorder %s468_s25, %s566_s0 }
  0x17   : > { %p298_p4 = pnand %p297_p3, %p296_p2  ;;  %p302_p8 = scmp.lt.u32.totalorder %s300_s4, %s295_s30 }
  0x18   : > { %p304_p9 = scmp.lt.u32.totalorder %s295_s30, %s468_s25 }
  0x19   : > { %p299_p7 = pneg %p298_p4  ;;  %p303_p10 = por %p302_p8, %p301_p5 }
  0x1b   : > { %p305_p0 = por %p304_p9, %p303_p10 }
  0x1d   : > { %p306_p1 = pnand %p305_p0, %p299_p7 }
  0x1f   : > { %309 = shalt.err (!%p306_p1)
}
  0x20   : > { %s310_s13 = scalar_lea.vmem %s476_s27, 128  ;;  %s393_s14 = smov [#allocation2]  }
  0x21   : > { %p311_p2 = scmp.ne.s32.totalorder %s476_s27, %s310_s13  ;;  %s315_s16 = sshll.u32 %s393_s14, 4  ;;  %s316_s16 = int_to_ptr.vmem [resolvable:$false] %s315_s16 }
  0x22   : > { %s317_s20 = scalar_lea.vmem %s316_s16, 256  ;;  %p318_p11 = scmp.lt.s32.totalorder %s476_s27, %s316_s16 }
  0x23   : > { %p313_p4 = pnand %p311_p2, %p297_p3  ;;  %p319_p5 = scmp.lt.s32.totalorder %s317_s20, %s310_s13 }
  0x25   : > { %p314_p12 = pneg %p313_p4  ;;  %p320_p8 = por %p319_p5, %p318_p11 }
  0x27   : > { %p321_p9 = pnand %p320_p8, %p314_p12 }
  0x29   : > { %324 = shalt.err (!%p321_p9)
}
  0x2a   : > { %250 = dma.hbm_to_vmem [thread:$0]  (!%p472_p13), %s468_s25, 128, %s476_s27, %s88_s29  }
  0x2b   : > { %p574_p0 = scmp.lt.s32.totalorder %s391_s9, 3  ;;  %p575_p1 = scmp.ge.s32.totalorder %s391_s9, 1 }
  0x2d   : > { %p104_p3 = pnand %p575_p1, %p574_p0 }
  0x2e   : > { %s510_s21 = sand.u32 (!%p104_p3), 1, %s383_s7  }
  0x2f   : > { %107 = sbr.rel (%p104_p3) target bundleno = 117 (0x75), region = 24  ;;  %s236_s22 = sshll.u32 (!%p104_p3), %s510_s21, 3 }
  0x30   : > { %s110_s23 = scalar_lea.sflag (!%p104_p3), [#allocation3], %s510_s21  ;;  %s113_s24 = scalar_lea.vmem (!%p104_p3), [#allocation2], %s236_s22 }
  0x36   : > { %370 = dma.done.wait (%p448_p6), %s110_s23, 128  }
  0x37   : > { %372 = vsyncadd (%p448_p6), %s110_s23, 4294967168  ;;  %v132_v0 = vld [vmem:[%s113_s24] sm:$0xff]  ;;  %s131_s25 = scalar_lea.vmem [#allocation5], %s236_s22  ;;  %s240_s27 = sshll.u32 %s426_s10, 7 }
  0x38   : > { %v238_v1 = vmul.f32 -1.442695, %v132_v0  ;;  %s160_s26 = sshll.u32 %s131_s25, 4  ;;  %s524_s29 = scalar_lea.hbm %s567_s1, %s240_s27  ;;  %s519_s26 = int_to_ptr.vmem [resolvable:$true] %s160_s26 }
  0x39   : > { %s147_s30 = scalar_lea.sflag [#allocation4], %s510_s21  ;;  %s325_s2 = scalar_lea.vmem %s519_s26, 128 }
  0x3a   : > { %289 = vpow2.f32 %v238_v1  ;;  %p326_p6 = scmp.ne.s32.totalorder %s519_s26, %s325_s2  ;;  %p576_p11 = scmp.ne.s32.totalorder %s571_s18, 0 }
  0x3b   : > { %s394_s10 = smov [#allocation5]  }
  0x3c   : > { %p327_p12 = pnand %p326_p6, %p576_p11  ;;  %s329_s3 = sshll.u32 %s394_s10, 4  ;;  %s330_s3 = int_to_ptr.vmem [resolvable:$false] %s329_s3 }
  0x3d   : > { %s331_s4 = scalar_lea.vmem %s330_s3, 256  ;;  %p332_p7 = scmp.lt.s32.totalorder %s519_s26, %s330_s3 }
  0x3e   : > { %p328_p13 = pneg %p327_p12  ;;  %p333_p10 = scmp.lt.s32.totalorder %s331_s4, %s325_s2 }
  0x40   : > { %p334_p2 = por %p333_p10, %p332_p7 }
  0x42   : > { %p335_p4 = pnand %p334_p2, %p328_p13 }
  0x44   : > { %v290_v2 = vpop.eup %289 }
  0x45   : > { %v136_v3 = vadd.f32 1.0, %v290_v2 }
  0x47   : > { %291 = vrcp.f32 %v136_v3 }
  0x51   : > { %v292_v4 = vpop.eup %291 }
  0x52   : > { %v139_v5 = vsub.f32 1.0, %v292_v4 }
  0x54   : > { %v140_v6 = vmul.f32 %v292_v4, %v139_v5 }
  0x56   : > { %293 = vlog2.f32 %v140_v6 }
  0x60   : > { %v294_v7 = vpop.eup %293 }
  0x61   : > { %v142_v8 = vmul.f32 0.6931472, %v294_v7 }
  0x63   : > { %v143_v9 = vmax.f32 %v142_v8, -100.0 }
  0x65   : > { %v144_v10 = vmul.f32 -0.5, %v143_v9 }
  0x67   : > { %145 = vst [vmem:[%s131_s25] sm:$0xff] %v144_v10 }
  0x68   : > { %338 = shalt.err (!%p335_p4)
}
  0x69   : > { %s339_s5 = scalar_lea.hbm %s524_s29, 128  ;;  %s343_s14 = scalar_lea.hbm %s567_s1, 256 }
  0x6a   : > { %p340_p5 = scmp.ne.s32.totalorder %s524_s29, %s339_s5  ;;  %p344_p0 = scmp.lt.u32.totalorder %s524_s29, %s567_s1 }
  0x6b   : > { %p345_p1 = scmp.lt.u32.totalorder %s343_s14, %s339_s5  ;;  %p347_p6 = scmp.lt.u32.totalorder %s339_s5, %s524_s29 }
  0x6c   : > { %p341_p8 = pnand %p340_p5, %p576_p11 }
  0x6d   : > { %p346_p3 = por %p345_p1, %p344_p0 }
  0x6e   : > { %p342_p9 = pneg %p341_p8 }
  0x6f   : > { %p348_p12 = por %p347_p6, %p346_p3 }
  0x71   : > { %p349_p13 = pnand %p348_p12, %p342_p9 }
  0x73   : > { %352 = shalt.err (!%p349_p13)
}
  0x74   : > { %245 = dma.vmem_to_hbm [thread:$0]  (%p576_p11), %s519_s26, 128, %s524_s29, %s147_s30  }
  0x75 PF: > { %s172_s21 = sand.u32 1, %s379_s6   ;;  %p577_p7 = scmp.ne.s32.totalorder %s572_s19, 0 }
  0x76   : > { %p578_p10 = scmp.ge.s32.totalorder %s391_s9, 2  ;;  %s173_s22 = scalar_lea.sflag [#allocation4], %s172_s21 }
  0x78   : > { %p252_p2 = pnand %p578_p10, %p577_p7 }
  0x7a   : > { %374 = dma.done.wait (!%p252_p2), %s173_s22, 128  }
  0x7b   : > { %376 = vsyncadd (!%p252_p2), %s173_s22, 4294967168  ;;  %p14_p4 = scmp.ge.s32.totalorder %s430_s12, 4   ;;  %s579_s6 = smov %s383_s7 }
  0x7c   : > { %s580_s7 = smov %s387_s8  ;;  %s581_s8 = smov %s442_s15 }
  0x7d   : > { %s582_s9 = smov %s430_s12  ;;  %16 = sbr.rel (!%p14_p4) target bundleno = 5 (0x5), region = 69 }
  0x84   :  { %178 = vsyncpa [#allocation3], 1 }
  0x85   :  { %180 = vsyncpa [#allocation3 + $0x1], 1 }
  0x86   :  { %181 = vsyncpa [#allocation4], 1 }
  0x87   :  { %183 = vsyncpa [#allocation4 + $0x1], 1 }

</bundles_post_ra>
